<compile_context>
chip_gen: v7x
topology: tpu7x:2x2x1
jax: 0.10.0
libtpu: 0.0.40
codegen_flags: <defaults>
</compile_context>

<pallas_src>
import functools

import jax
import jax.numpy as jnp
from jax import lax
from jax.experimental import pallas as pl
from jax.experimental.pallas import tpu as pltpu

_EPS = 1e-5  # PyTorch BatchNorm2d default eps

_MAX_LANE = 32768                       # lane-tile cap (elements; multiple of 128)
_MAX_BLOCK_BYTES = 8 * 1024 * 1024      # per-block budget (4-8 MiB ~= 86%+ of roofline)
_VMEM_LIMIT_BYTES = 40 * 1024 * 1024    # ~4x block (double-buffered in+out) + slack;
                                        # > v5e's 16 MiB default, < v7x's 64 MiB physical
_FLAT_LANE = 8192                       # lane width for the flattened small-spatial path


def _round_up(x, m):
    return ((x + m - 1) // m) * m


def _sublane_pack(dtype):
    # native sublane packing: 8 rows for 4-byte, 16 for 2-byte, 32 for 1-byte dtypes
    return max(8, 32 // jnp.dtype(dtype).itemsize)


# ---------------------------------------------------------------------------
# Main path: (B*C, H*W) rows with per-row folded scale/shift (H*W multiple of 128)
# ---------------------------------------------------------------------------
def _bn_rows_kernel(x_ref, scale_ref, shift_ref, o_ref):
    x = x_ref[...].astype(jnp.float32)
    o_ref[...] = (x * scale_ref[...] + shift_ref[...]).astype(o_ref.dtype)


# ---------------------------------------------------------------------------
# Small / ragged spatial path: fully flattened lane-dense view; channel recovered
# from the global flat element index inside the kernel.
# ---------------------------------------------------------------------------
def _floordiv_const(x, d):
    """floor(x / d) for non-negative int32 x and positive Python int d.

    Avoids vector integer division: float-reciprocal multiply plus one
    correction step; exact for x < 2**24 (guaranteed by the wrapper).
    """
    if d == 1:
        return x
    q = jnp.floor(x.astype(jnp.float32) * jnp.float32(1.0 / d)).astype(jnp.int32)
    r = x - q * d
    q = jnp.where(r < 0, q - 1, q)
    r = jnp.where(r < 0, r + d, r)
    q = jnp.where(r >= d, q + 1, q)
    return q


def _bn_flat_kernel(scale_ref, shift_ref, x_ref, o_ref, *,
                    hw, num_ch, row_tile, lane_tile):
    i = pl.program_id(0)
    row_base = i * row_tile
    rows = lax.broadcasted_iota(jnp.int32, (row_tile, lane_tile), 0) + row_base
    lanes = lax.broadcasted_iota(jnp.int32, (row_tile, lane_tile), 1)
    flat = rows * lane_tile + lanes                    # global flattened element index
    ch = _floordiv_const(flat, hw)                     # = b * C + c
    ch = ch - _floordiv_const(ch, num_ch) * num_ch     # = c  (channel index)

    x = x_ref[...].astype(jnp.float32)
    scale = jnp.zeros(x.shape, jnp.float32)
    shift = jnp.zeros(x.shape, jnp.float32)
    for c in range(num_ch):                            # tiny C: pure VALU filler (free here)
        m = ch == c
        scale = jnp.where(m, scale_ref[c], scale)
        shift = jnp.where(m, shift_ref[c], shift)
    o_ref[...] = (x * scale + shift).astype(o_ref.dtype)


def batchnorm2d(x, weight, bias, running_mean, running_var, *, eps=_EPS):
    """Inference-mode BatchNorm2d over NCHW input x."""
    B, C, H, W = x.shape
    R = B * C
    L = H * W
    N = R * L

    # Fold the 4 params into per-channel scale/shift in f32 (PyTorch keeps running
    # stats in f32 even for low-precision activations).
    w32 = weight.astype(jnp.float32)
    b32 = bias.astype(jnp.float32)
    m32 = running_mean.astype(jnp.float32)
    v32 = running_var.astype(jnp.float32)
    scale_c = w32 * lax.rsqrt(v32 + eps)      # (C,)
    shift_c = b32 - m32 * scale_c             # (C,)

    dtype_bytes = jnp.dtype(x.dtype).itemsize
    pack = _sublane_pack(x.dtype)

    lane_ok = (L >= 128) and (L % 128 == 0)
    # the flat path's float-index trick needs flat indices < 2**24 to stay exact
    use_flat = (not lane_ok) and (_round_up(N, 128) < (1 << 24))

    if not use_flat:
        # ----- (B*C, H*W) per-row path -------------------------------------
        scale_r = jnp.tile(scale_c, B).reshape(R, 1)   # row k -> channel k % C
        shift_r = jnp.tile(shift_c, B).reshape(R, 1)
        x2 = x.reshape(R, L)                           # pure reshape, no transpose

        col_tile = L if L <= _MAX_LANE else _MAX_LANE
        rows_budget = max(
            pack, (_MAX_BLOCK_BYTES // (col_tile * dtype_bytes)) // pack * pack)
        if L <= col_tile:
            # single column step: force >=2 row steps so both v7x TCs get work
            row_tile = min(rows_budget, _round_up(pl.cdiv(R, 2), pack))
        else:
            # column grid already provides parallel steps; spend budget on rows
            row_tile = rows_budget
        if row_tile >= R:
            row_tile = R                               # full-extent block for tiny inputs

        # cols innermost: scale/shift block index constant across j -> no re-fetch
        grid = (pl.cdiv(R, row_tile), pl.cdiv(L, col_tile))

        out2 = pl.pallas_call(
            _bn_rows_kernel,
            out_shape=jax.ShapeDtypeStruct((R, L), x.dtype),
            grid=grid,
            in_specs=[
                pl.BlockSpec((row_tile, col_tile), lambda i, j: (i, j)),
                pl.BlockSpec((row_tile, 1), lambda i, j: (i, 0)),
                pl.BlockSpec((row_tile, 1), lambda i, j: (i, 0)),
            ],
            out_specs=pl.BlockSpec((row_tile, col_tile), lambda i, j: (i, j)),
            compiler_params=pltpu.CompilerParams(
                dimension_semantics=("parallel", "parallel"),
                vmem_limit_bytes=_VMEM_LIMIT_BYTES),
        )(x2, scale_r, shift_r)
        return out2.reshape(B, C, H, W)

    # ----- flattened lane-dense path (H*W < 128 or ragged) ------------------
    Lpad = _FLAT_LANE if N >= _FLAT_LANE else _round_up(N, 128)
    Npad = _round_up(N, Lpad)
    Rp = Npad // Lpad

    xf = x.reshape(-1)
    if Npad != N:
        xf = jnp.pad(xf, (0, Npad - N))
    xf = xf.reshape(Rp, Lpad)

    rows_budget = max(
        pack, (_MAX_BLOCK_BYTES // (Lpad * dtype_bytes)) // pack * pack)
    # column grid is always 1 here -> keep >=2 row steps for megacore when possible
    row_tile = min(rows_budget, _round_up(pl.cdiv(Rp, 2), pack))
    if row_tile >= Rp:
        row_tile = Rp

    kernel = functools.partial(
        _bn_flat_kernel, hw=L, num_ch=C, row_tile=row_tile, lane_tile=Lpad)

    outf = pl.pallas_call(
        kernel,
        out_shape=jax.ShapeDtypeStruct((Rp, Lpad), x.dtype),
        grid=(pl.cdiv(Rp, row_tile),),
        in_specs=[
            pl.BlockSpec(memory_space=pltpu.MemorySpace.SMEM),   # scale table (C,)
            pl.BlockSpec(memory_space=pltpu.MemorySpace.SMEM),   # shift table (C,)
            pl.BlockSpec((row_tile, Lpad), lambda i: (i, 0)),
        ],
        out_specs=pl.BlockSpec((row_tile, Lpad), lambda i: (i, 0)),
        compiler_params=pltpu.CompilerParams(
            dimension_semantics=("parallel",),
            vmem_limit_bytes=_VMEM_LIMIT_BYTES),
    )(scale_c, shift_c, xf)

    out = outf.reshape(-1)
    if Npad != N:
        out = out[:N]
    return out.reshape(B, C, H, W)


if __name__ == "__main__":
    key = jax.random.PRNGKey(0)
    kx, kw, kb, km, kv, kx2 = jax.random.split(key, 6)

    C = 5  # BatchNorm2d(5) -> 5 channels
    weight = jax.random.normal(kw, (C,), dtype=jnp.float32) * 0.5 + 1.0
    bias = jax.random.normal(kb, (C,), dtype=jnp.float32) * 0.1
    running_mean = jax.random.normal(km, (C,), dtype=jnp.float32) * 0.2
    running_var = jax.random.uniform(kv, (C,), dtype=jnp.float32,
                                     minval=0.5, maxval=1.5)

    # pure-JAX reference (eval-mode BatchNorm2d semantics)
    scale = weight * lax.rsqrt(running_var + _EPS)
    shift = bias - running_mean * scale

    def ref(xa):
        return xa * scale[None, :, None, None] + shift[None, :, None, None]

    # main path: H*W = 256 (lane-dense multiple of 128)
    x = jax.random.normal(kx, (2, C, 16, 16), dtype=jnp.float32)
    out = jax.block_until_ready(
        batchnorm2d(x, weight, bias, running_mean, running_var))
    assert out.shape == x.shape
    assert jnp.allclose(out, ref(x), atol=1e-5, rtol=1e-5)

    # small-spatial path: H*W = 49 (< 128, ragged) -> flattened lane-dense kernel
    x_small = jax.random.normal(kx2, (2, C, 7, 7), dtype=jnp.float32)
    out_small = jax.block_until_ready(
        batchnorm2d(x_small, weight, bias, running_mean, running_var))
    assert out_small.shape == x_small.shape
    assert jnp.allclose(out_small, ref(x_small), atol=1e-5, rtol=1e-5)

    print("KERNEL_OK")
</pallas_src>

<mosaic_0001>
module attributes {stable_mosaic.version = 11 : i64} {
  func.func @_bn_rows_kernel(%arg0: i32, %arg1: i32, %arg2: memref<8x256xf32, #tpu.memory_space<vmem>>, %arg3: memref<8x1xf32, #tpu.memory_space<vmem>>, %arg4: memref<8x1xf32, #tpu.memory_space<vmem>>, %arg5: memref<8x256xf32, #tpu.memory_space<vmem>>) attributes {dimension_semantics = [#tpu.dimension_semantics<parallel>, #tpu.dimension_semantics<parallel>], iteration_bounds = array<i64: 2, 1>, scalar_prefetch = 0 : i64, scratch_operands = 0 : i64, tpu.core_type = #tpu.core_type<tc>, window_params = [{transform_indices = @transform_0, window_bounds = array<i64: 8, 256>}, {transform_indices = @transform_1, window_bounds = array<i64: 8, 1>}, {transform_indices = @transform_2, window_bounds = array<i64: 8, 1>}, {transform_indices = @transform_3, window_bounds = array<i64: 8, 256>}]} {
    %c0 = arith.constant 0 : index
    %c0_0 = arith.constant 0 : index
    %0 = vector.load %arg2[%c0, %c0_0] : memref<8x256xf32, #tpu.memory_space<vmem>>, vector<8x256xf32>
    %c0_1 = arith.constant 0 : index
    %c0_2 = arith.constant 0 : index
    %1 = vector.load %arg3[%c0_1, %c0_2] : memref<8x1xf32, #tpu.memory_space<vmem>>, vector<8x1xf32>
    %2 = vector.broadcast %1 : vector<8x1xf32> to vector<8x256xf32>
    %3 = arith.mulf %0, %2 : vector<8x256xf32>
    %c0_3 = arith.constant 0 : index
    %c0_4 = arith.constant 0 : index
    %4 = vector.load %arg4[%c0_3, %c0_4] : memref<8x1xf32, #tpu.memory_space<vmem>>, vector<8x1xf32>
    %5 = vector.broadcast %4 : vector<8x1xf32> to vector<8x256xf32>
    %6 = arith.addf %3, %5 : vector<8x256xf32>
    %c0_5 = arith.constant 0 : index
    %c0_6 = arith.constant 0 : index
    %7 = vector.load %arg5[%c0_5, %c0_6] : memref<8x256xf32, #tpu.memory_space<vmem>>, vector<8x256xf32>
    tpu.vector_store %arg5[%c0_5, %c0_6], %6 {strides = array<i32>} : memref<8x256xf32, #tpu.memory_space<vmem>>, vector<8x256xf32>,
    return
  }
  func.func @transform_0(%arg0: i32, %arg1: i32) -> (i32, i32) {
    %c0_i32 = arith.constant 0 : i32
    return %arg0, %arg1 : i32, i32
  }
  func.func @transform_1(%arg0: i32, %arg1: i32) -> (i32, i32) {
    %c0_i32 = arith.constant 0 : i32
    %c0_i32_0 = arith.constant 0 : i32
    return %arg0, %c0_i32 : i32, i32
  }
  func.func @transform_2(%arg0: i32, %arg1: i32) -> (i32, i32) {
    %c0_i32 = arith.constant 0 : i32
    %c0_i32_0 = arith.constant 0 : i32
    return %arg0, %c0_i32 : i32, i32
  }
  func.func @transform_3(%arg0: i32, %arg1: i32) -> (i32, i32) {
    %c0_i32 = arith.constant 0 : i32
    return %arg0, %arg1 : i32, i32
  }
}

</mosaic_0001>

<bundles_post_ra>
// kernel: tpu_custom_call.1
= control target key start
LH: loop header
LB: loop body
LE: loop exit
PB: predicated region body
PF: predicated region fallthrough
CT: control target
= control target key end

     0   :  { %8 = vsyncpa [#allocation3], 0  ;;  %s665_s0 = inlined_call_operand.vmem [shape: f32[10,256], index: 0, kind: input, shape index: {}]   ;;  %s666_s1 = inlined_call_operand.vmem [shape: f32[10,1], index: 1, kind: input, shape index: {}]   ;;  %s667_s2 = inlined_call_operand.vmem [shape: f32[10,1], index: 2, kind: input, shape index: {}]   ;;  %s668_s3 = inlined_call_operand.hbm [shape: f32[10,256], index: 3, kind: output, shape index: {}]  }
   0x1   :  { %10 = vsyncpa [#allocation3 + $0x1], 0  ;;  %s547_s12 = smov 0   ;;  %s549_s13 = smov 0  }
   0x2   :  { %s551_s14 = smov 0   ;;  %s553_s15 = smov 0  }
   0x3   :  { %s555_s16 = smov 0   ;;  %s557_s17 = smov 0  }
   0x4 LB: > { %s371_s18 = sadd.s32 4294967295, %s523_s17   ;;  %s372_s19 = sadd.s32 4294967294, %s523_s17   ;;  %s523_s17 = sphi %s557_s17, %s16_s17   ;;  %s519_s16 = sphi %s555_s16, %s675_s16   ;;  %s515_s15 = sphi %s553_s15, %s674_s15   ;;  %s511_s14 = sphi %s551_s14, %s673_s14   ;;  %s507_s13 = sphi %s549_s13, %s672_s13   ;;  %s503_s12 = sphi %s547_s12, %s671_s12  }
   0x5   : > { %s28_s20 = sadd.s32 1, %s519_s16  ;;  %s117_s21 = sadd.s32 1, %s511_s14 }
   0x6   : > { %p30_p0 = scmp.ge.s32.totalorder %s28_s20, 2  ;;  %p127_p1 = scmp.ne.s32.totalorder %s511_s14, %s507_s13 }
   0x7   : > { %p128_p2 = scmp.eq.s32.totalorder %s371_s18, 1  ;;  %p133_p3 = scmp.ne.s32.totalorder %s507_s13, %s503_s12 }
   0x8   : > { %s677_s20 = smov (%p30_p0, %s28_s20), 0  ;;  %p134_p5 = scmp.eq.s32.totalorder %s372_s19, 1 }
   0x9   : > { %p587_p4 = por %p128_p2, %p127_p1  ;;  %s112_s23 = ssub.s32 %s519_s16, %s677_s20 }
   0xa   : > { %p375_p6 = scmp.ge.s32.totalorder %s523_s17, 1  ;;  %p115_p7 = scmp.eq.s32.totalorder %s112_s23, 0 }
   0xb   : > { %p594_p8 = por %p134_p5, %p133_p3  ;;  %p179_p9 = scmp.lt.s32.totalorder %s523_s17, 3 }
   0xc   : > { %s600_s25 = scalar_select %p115_p7, %s511_s14, %s117_s21  }
   0xd   : > { %p180_p10 = pnand %p375_p6, %p179_p9 }
   0xe   : > { %p216_p11 = scmp.lt.s32.totalorder (!%p180_p10), %s515_s15, 1  ;;  %v525_v0 = vmov (!%p180_p10), 0   ;;  %s212_s7 = sand.u32 (!%p180_p10), 1, %s507_s13  }
   0xf   : > { %183 = sbr.rel (%p180_p10) target bundleno = 175 (0xaf), region = 32  ;;  %444 = vset.pattern.permute.xlu0 (!%p180_p10), %v525_v0  ;;  %s376_s9 = sshll.u32 (!%p180_p10), %s212_s7, 4 }
  0x10   : > { %s387_s19 = sshll.u32 (!%p180_p10), %s515_s15, 8  ;;  %s214_s21 = scalar_lea.vmem (!%p180_p10), [#allocation2], %s376_s9 }
  0x11   : > { %s271_s23 = sshll.u32 (!%p180_p10), %s214_s21, 4  ;;  %s620_s23 = int_to_ptr.vmem [resolvable:$true] %s271_s23 }
  0x12   : > { %s445_s29 = scalar_lea.vmem (!%p180_p10), %s620_s23, 256 }
  0x13   : > { %p446_p12 = scmp.ne.s32.totalorder (!%p180_p10), %s620_s23, %s445_s29 }
  0x15   : > { %p447_p13 = pnand (!%p180_p10), %p446_p12, %p587_p4 }
  0x16   : > { %s217_s26 = scalar_select %p216_p11, %s515_s15, 1 }
  0x17   : > { %s255_s15 = scalar_lea.sflag [#allocation3], %s212_s7  ;;  %p448_p0 = pneg %p447_p13 }
  0x18   : > { %s379_s27 = sshll.u32 %s217_s26, 3  ;;  %s386_s8 = sshll.u32 %s217_s26, 4 }
  0x19   : > { %s228_s30 = scalar_lea.vmem %s666_s1, %s379_s27  ;;  %s232_s6 = scalar_lea.vmem %s667_s2, %s379_s27 }
  0x1a   : > { %v236_v1 = vld [vmem:[%s228_s30] sm:$0xff]  ;;  %s223_s18 = scalar_lea.vmem %s665_s0, %s386_s8  ;;  %s618_s26 = scalar_lea.hbm %s668_s3, %s387_s19 }
  0x1b   : > { %239 = vperm.xlu0 %444, %v236_v1   ;;  %v244_v2 = vld [vmem:[%s232_s6] sm:$0xff]  ;;  %v235_v5 = vld [vmem:[%s223_s18 + $0x8] sm:$0xff]  ;;  %s526_s30 = smov [#allocation2]  }
  0x1c   : > { %v234_v4 = vld [vmem:[%s223_s18] sm:$0xff]  ;;  %s449_s4 = sshll.u32 %s526_s30, 4  ;;  %s450_s4 = int_to_ptr.vmem [resolvable:$false] %s449_s4 }
  0x1d   : > { %s451_s5 = scalar_lea.vmem %s450_s4, 512  ;;  %p452_p1 = scmp.lt.s32.totalorder %s620_s23, %s450_s4 }
  0x1e   : > { %p453_p2 = scmp.lt.s32.totalorder %s451_s5, %s445_s29 }
  0x1f   : > { %247 = vperm.xlu0 %444, %v244_v2  }
  0x20   : > { %p454_p3 = por %p453_p2, %p452_p1 }
  0x22   : > { %p455_p5 = pnand %p454_p3, %p448_p0 }
  0x9a   : > { %v240_v3 = vpop.permute.xlu0 %239 }
  0x9b   : > { %v242_v6 = vmul.f32 %v240_v3, %v234_v4  ;;  %v243_v7 = vmul.f32 %v240_v3, %v235_v5 }
  0x9e   : > { %v248_v8 = vpop.permute.xlu0 %247 }
  0x9f   : > { %v250_v9 = vadd.f32 %v248_v8, %v242_v6  ;;  %v251_v10 = vadd.f32 %v248_v8, %v243_v7 }
  0xa1   : > { %252 = vst [vmem:[%s214_s21] sm:$0xff] %v250_v9  ;;  %253 = vst [vmem:[%s214_s21 + $0x8] sm:$0xff] %v251_v10 }
  0xa2   : > { %458 = shalt.err (!%p455_p5)
}
  0xa3   : > { %s459_s6 = scalar_lea.hbm %s618_s26, 256  ;;  %s463_s9 = scalar_lea.hbm %s668_s3, 512 }
  0xa4   : > { %p460_p6 = scmp.ne.s32.totalorder %s618_s26, %s459_s6  ;;  %p464_p10 = scmp.lt.u32.totalorder %s618_s26, %s668_s3 }
  0xa5   : > { %p465_p11 = scmp.lt.u32.totalorder %s463_s9, %s459_s6  ;;  %p467_p13 = scmp.lt.u32.totalorder %s459_s6, %s618_s26 }
  0xa6   : > { %p461_p7 = pnand %p460_p6, %p587_p4 }
  0xa7   : > { %p466_p12 = por %p465_p11, %p464_p10 }
  0xa8   : > { %p462_p9 = pneg %p461_p7 }
  0xa9   : > { %p468_p0 = por %p467_p13, %p466_p12 }
  0xab   : > { %p469_p1 = pnand %p468_p0, %p462_p9 }
  0xad   : > { %472 = shalt.err (!%p469_p1)
}
  0xae   : > { %388 = dma.vmem_to_hbm [thread:$0]  (%p587_p4), %s620_s23, 256, %s618_s26, %s255_s15  }
  0xaf PF: > { %p394_p2 = scmp.ge.s32.totalorder %s523_s17, 2  ;;  %s283_s18 = sand.u32 1, %s503_s12  }
  0xb0   : > { %s284_s19 = scalar_lea.sflag [#allocation3], %s283_s18 }
  0xb1   : > { %p391_p3 = pnand %p394_p2, %p594_p8 }
  0xb3   : > { %498 = dma.done.wait (!%p391_p3), %s284_s19, 256  }
  0xb4   : > { %500 = vsyncadd (!%p391_p3), %s284_s19, 4294967040  ;;  %s16_s17 = sadd.s32 1, %s523_s17   ;;  %s671_s12 = smov %s507_s13 }
  0xb5   : > { %p13_p5 = scmp.ge.s32.totalorder %s16_s17, 4   ;;  %s672_s13 = smov %s511_s14 }
  0xb6   : > { %s673_s14 = smov %s600_s25  ;;  %s674_s15 = smov %s519_s16 }
  0xb7   : > { %s675_s16 = smov %s677_s20  ;;  %15 = sbr.rel (!%p13_p5) target bundleno = 4 (0x4), region = 73 }
  0xbe   :  { %289 = vsyncpa [#allocation3], 1 }
  0xbf   :  { %291 = vsyncpa [#allocation3 + $0x1], 1 }

</bundles_post_ra>
